<compile_context>
chip_gen: v6e
topology: v6e:2x2x1
jax: 0.10.0
libtpu: 0.0.40
codegen_flags: <defaults>
</compile_context>

<pallas_src>
import jax
import jax.numpy as jnp
from jax.experimental import pallas as pl
from jax.experimental.pallas import tpu as pltpu

LANE = 128            # lane width: hidden/output dims are padded to this
SUBLANE = 8           # sublane width: batch tiles are a multiple of this
HIDDEN = 64           # Action_net hidden / output width
MIN_SPLIT_ROWS = 256  # only force a 2-step grid (v7x dual-TC) if each half has >= this many rows


def _round_up(x, m):
    return (x + m - 1) // m * m


def action_net_kernel(x_ref, w1_ref, w2_ref, w3_ref, b_ref, o_ref):
    # x streams over the batch; weights/biases are VMEM-resident (same block every step).
    x = x_ref[...].astype(jnp.bfloat16)        # bf16 operands -> native MXU path
    b = b_ref[...]                             # (3, 128) f32: rows = [b1; b2; b3]

    # layer 1 + ReLU (f32 accumulate, f32 bias/ReLU)
    h = jnp.dot(x, w1_ref[...], preferred_element_type=jnp.float32) + b[0:1, :]
    h = jnp.maximum(h, 0.0).astype(jnp.bfloat16)

    # layer 2 + ReLU
    h = jnp.dot(h, w2_ref[...], preferred_element_type=jnp.float32) + b[1:2, :]
    h = jnp.maximum(h, 0.0).astype(jnp.bfloat16)

    # layer 3 (no activation) -> lane-dense output slab
    y = jnp.dot(h, w3_ref[...], preferred_element_type=jnp.float32) + b[2:3, :]
    o_ref[...] = y.astype(o_ref.dtype)


def action_net_forward(actions, padded_params, *, tm=1024, slice_output=True):
    """actions: (B, num_inputs) f32 -> (B, 64) f32 (matches PyTorch Action_net.forward)."""
    B, num_inputs = actions.shape
    w1 = padded_params["w1"]
    w2 = padded_params["w2"]
    w3 = padded_params["w3"]
    b_all = padded_params["b"]
    assert w1.shape[0] == num_inputs, (w1.shape, num_inputs)
    h_pad = w1.shape[1]

    # Batch tile: multiple of 8 sublanes, capped at `tm`.  If the whole batch fits a single
    # grid step but is big enough to matter, split into two steps so v7x's two TensorCores
    # both get work under dimension_semantics=("parallel",).
    B8 = _round_up(B, SUBLANE)
    TM = min(tm, B8)
    if TM == B8 and B8 >= 2 * MIN_SPLIT_ROWS:
        TM = _round_up((B8 + 1) // 2, SUBLANE)
    B_pad = _round_up(B, TM)

    # Pad only the batch dim (feature dim stays at num_inputs).  Zero rows are inert.
    if B_pad != B:
        x = jnp.zeros((B_pad, num_inputs), actions.dtype).at[:B, :].set(actions)
    else:
        x = actions

    def resident(shape):
        # Full-array block, same block index every grid step -> fetched once, stays in VMEM.
        return pl.BlockSpec(shape, lambda i: (0, 0))

    grid_spec = pltpu.PrefetchScalarGridSpec(
        num_scalar_prefetch=0,
        grid=(B_pad // TM,),
        in_specs=[
            pl.BlockSpec((TM, num_inputs), lambda i: (i, 0)),  # activations stream over batch
            resident((num_inputs, h_pad)),                     # w1 (bf16)
            resident((h_pad, h_pad)),                          # w2 (bf16)
            resident((h_pad, h_pad)),                          # w3 (bf16)
            resident((3, h_pad)),                              # merged biases (f32)
        ],
        out_specs=pl.BlockSpec((TM, h_pad), lambda i: (i, 0)),
    )

    # Real (unpadded) flops; bytes = what actually moves HBM<->VMEM.
    flops = 2 * B * HIDDEN * (num_inputs + 2 * HIDDEN)
    bytes_accessed = (4 * B_pad * num_inputs                        # x (f32)
                      + 4 * B_pad * h_pad                           # output slab (f32)
                      + 2 * (num_inputs * h_pad + 2 * h_pad * h_pad)  # bf16 weights
                      + 4 * 3 * h_pad)                              # f32 biases

    out_padded = pl.pallas_call(
        action_net_kernel,
        out_shape=jax.ShapeDtypeStruct((B_pad, h_pad), jnp.float32),
        grid_spec=grid_spec,
        compiler_params=pltpu.CompilerParams(
            dimension_semantics=("parallel",)),
        cost_estimate=pl.CostEstimate(
            flops=flops, transcendentals=0, bytes_accessed=bytes_accessed),
    )(x, w1, w2, w3, b_all)

    if not slice_output:
        # (B_pad, 128) slab: cols >= 64 are exact zeros; rows >= B are bias-propagated junk.
        return out_padded
    return out_padded[:B, :HIDDEN]


# ---- parameter init (PyTorch nn.Linear default: U(-1/sqrt(fan_in), 1/sqrt(fan_in))) ----

def _linear_init(key, fan_in, fan_out):
    kw, kb = jax.random.split(key)
    bound = 1.0 / jnp.sqrt(jnp.float32(fan_in))
    w = jax.random.uniform(kw, (fan_in, fan_out), jnp.float32, -bound, bound)
    b = jax.random.uniform(kb, (fan_out,), jnp.float32, -bound, bound)
    return w, b


def init_params(key, num_inputs, hidden=HIDDEN):
    k1, k2, k3 = jax.random.split(key, 3)
    w1, b1 = _linear_init(k1, num_inputs, hidden)
    w2, b2 = _linear_init(k2, hidden, hidden)
    w3, b3 = _linear_init(k3, hidden, hidden)
    return {"w1": w1, "b1": b1, "w2": w2, "b2": b2, "w3": w3, "b3": b3}


def pad_params(params):
    """One-time prep: pad hidden/output dims to 128 lanes, cast weights to bf16,
    keep biases in f32 and merge them into one (3, 128) operand."""
    h_pad = _round_up(HIDDEN, LANE)

    def pad_w(w, rows):
        out = jnp.zeros((rows, h_pad), jnp.bfloat16)
        return out.at[:w.shape[0], :w.shape[1]].set(w.astype(jnp.bfloat16))

    def pad_b(b):
        return jnp.zeros((h_pad,), jnp.float32).at[:b.shape[-1]].set(b.reshape(-1))

    w1 = pad_w(params["w1"], params["w1"].shape[0])   # (num_inputs, 128) bf16
    w2 = pad_w(params["w2"], h_pad)                   # (128, 128) bf16 (zero-padded rows inert)
    w3 = pad_w(params["w3"], h_pad)                   # (128, 128) bf16
    b_all = jnp.stack([pad_b(params["b1"]), pad_b(params["b2"]), pad_b(params["b3"])])
    return {"w1": w1, "w2": w2, "w3": w3, "b": b_all}


if __name__ == "__main__":
    key = jax.random.PRNGKey(0)
    k_params, k_a1, k_a2 = jax.random.split(key, 3)

    num_inputs = 16
    params = init_params(k_params, num_inputs)
    padded = pad_params(params)   # done once, off the hot path

    # Pure-JAX references.
    def ref_f32(x, p):
        h = jnp.maximum(x @ p["w1"] + p["b1"], 0.0)
        h = jnp.maximum(h @ p["w2"] + p["b2"], 0.0)
        return h @ p["w3"] + p["b3"]

    def ref_bf16(x, p):
        # Same quantization as the kernel: bf16 dot operands, f32 accumulate, f32 bias/ReLU.
        h = x.astype(jnp.bfloat16)
        h = jnp.maximum(jnp.dot(h, p["w1"].astype(jnp.bfloat16),
                                preferred_element_type=jnp.float32) + p["b1"], 0.0)
        h = h.astype(jnp.bfloat16)
        h = jnp.maximum(jnp.dot(h, p["w2"].astype(jnp.bfloat16),
                                preferred_element_type=jnp.float32) + p["b2"], 0.0)
        h = h.astype(jnp.bfloat16)
        return jnp.dot(h, p["w3"].astype(jnp.bfloat16),
                       preferred_element_type=jnp.float32) + p["b3"]

    # Main example: small batch, single grid step.
    batch = 8
    actions = jax.random.normal(k_a1, (batch, num_inputs), jnp.float32)
    out = action_net_forward(actions, padded)
    jax.block_until_ready(out)
    assert out.shape == (batch, HIDDEN), out.shape

    exp_q = ref_bf16(actions, params)
    assert jnp.allclose(out, exp_q, atol=2e-3, rtol=2e-3), (
        float(jnp.max(jnp.abs(out - exp_q))))
    exp_f = ref_f32(actions, params)
    assert jnp.allclose(out, exp_f, atol=5e-2, rtol=5e-2), (
        float(jnp.max(jnp.abs(out - exp_f))))

    # Exercise multi-step grid + batch padding (still small shapes).
    batch2 = 40
    actions2 = jax.random.normal(k_a2, (batch2, num_inputs), jnp.float32)
    out2 = action_net_forward(actions2, padded, tm=16)
    jax.block_until_ready(out2)
    assert out2.shape == (batch2, HIDDEN), out2.shape
    exp2 = ref_bf16(actions2, params)
    assert jnp.allclose(out2, exp2, atol=2e-3, rtol=2e-3), (
        float(jnp.max(jnp.abs(out2 - exp2))))

    print("KERNEL_OK")
</pallas_src>

<mosaic_0001>
module attributes {stable_mosaic.version = 11 : i64} {
  func.func @action_net_kernel(%arg0: i32, %arg1: memref<8x16xf32, #tpu.memory_space<vmem>>, %arg2: memref<16x128xbf16, #tpu.memory_space<vmem>>, %arg3: memref<128x128xbf16, #tpu.memory_space<vmem>>, %arg4: memref<128x128xbf16, #tpu.memory_space<vmem>>, %arg5: memref<3x128xf32, #tpu.memory_space<vmem>>, %arg6: memref<8x128xf32, #tpu.memory_space<vmem>>) attributes {dimension_semantics = [#tpu.dimension_semantics<parallel>], iteration_bounds = array<i64: 1>, scalar_prefetch = 0 : i64, scratch_operands = 0 : i64, tpu.core_type = #tpu.core_type<tc>, window_params = [{transform_indices = @transform_0, window_bounds = array<i64: 8, 16>}, {pipeline_mode = #tpu.pipeline_mode<synchronous>, transform_indices = @transform_1, window_bounds = array<i64: 16, 128>}, {pipeline_mode = #tpu.pipeline_mode<synchronous>, transform_indices = @transform_2, window_bounds = array<i64: 128, 128>}, {pipeline_mode = #tpu.pipeline_mode<synchronous>, transform_indices = @transform_3, window_bounds = array<i64: 128, 128>}, {pipeline_mode = #tpu.pipeline_mode<synchronous>, transform_indices = @transform_4, window_bounds = array<i64: 3, 128>}, {transform_indices = @transform_5, window_bounds = array<i64: 8, 128>}]} {
    %c0 = arith.constant 0 : index
    %c0_0 = arith.constant 0 : index
    %0 = vector.load %arg1[%c0, %c0_0] : memref<8x16xf32, #tpu.memory_space<vmem>>, vector<8x16xf32>
    %1 = arith.truncf %0 : vector<8x16xf32> to vector<8x16xbf16>
    %c0_1 = arith.constant 0 : index
    %c0_2 = arith.constant 0 : index
    %2 = vector.load %arg5[%c0_1, %c0_2] : memref<3x128xf32, #tpu.memory_space<vmem>>, vector<3x128xf32>
    %c0_3 = arith.constant 0 : index
    %c0_4 = arith.constant 0 : index
    %3 = vector.load %arg2[%c0_3, %c0_4] : memref<16x128xbf16, #tpu.memory_space<vmem>>, vector<16x128xbf16>
    %cst = arith.constant dense<0.000000e+00> : vector<8x128xf32>
    %4 = tpu.matmul %1, %3, %cst {dimension_numbers = #tpu.dot_dimension_numbers<[1], [0], [0], [1], [0, 0, 1, 1], [], []>} : vector<8x16xbf16>, vector<16x128xbf16>, vector<8x128xf32> -> vector<8x128xf32>
    %5 = vector.extract_strided_slice %2 {offsets = [0, 0], sizes = [1, 128], strides = [1, 1]} : vector<3x128xf32> to vector<1x128xf32>
    %6 = vector.broadcast %5 : vector<1x128xf32> to vector<8x128xf32>
    %7 = arith.addf %4, %6 : vector<8x128xf32>
    %cst_5 = arith.constant 0.000000e+00 : f32
    %8 = vector.broadcast %cst_5 : f32 to vector<8x128xf32>
    %9 = arith.maximumf %7, %8 : vector<8x128xf32>
    %10 = arith.truncf %9 : vector<8x128xf32> to vector<8x128xbf16>
    %c0_6 = arith.constant 0 : index
    %c0_7 = arith.constant 0 : index
    %11 = vector.load %arg3[%c0_6, %c0_7] : memref<128x128xbf16, #tpu.memory_space<vmem>>, vector<128x128xbf16>
    %cst_8 = arith.constant dense<0.000000e+00> : vector<8x128xf32>
    %12 = tpu.matmul %10, %11, %cst_8 {dimension_numbers = #tpu.dot_dimension_numbers<[1], [0], [0], [1], [0, 0, 1, 1], [], []>} : vector<8x128xbf16>, vector<128x128xbf16>, vector<8x128xf32> -> vector<8x128xf32>
    %13 = vector.extract_strided_slice %2 {offsets = [1, 0], sizes = [1, 128], strides = [1, 1]} : vector<3x128xf32> to vector<1x128xf32>
    %14 = vector.broadcast %13 : vector<1x128xf32> to vector<8x128xf32>
    %15 = arith.addf %12, %14 : vector<8x128xf32>
    %cst_9 = arith.constant 0.000000e+00 : f32
    %16 = vector.broadcast %cst_9 : f32 to vector<8x128xf32>
    %17 = arith.maximumf %15, %16 : vector<8x128xf32>
    %18 = arith.truncf %17 : vector<8x128xf32> to vector<8x128xbf16>
    %c0_10 = arith.constant 0 : index
    %c0_11 = arith.constant 0 : index
    %19 = vector.load %arg4[%c0_10, %c0_11] : memref<128x128xbf16, #tpu.memory_space<vmem>>, vector<128x128xbf16>
    %cst_12 = arith.constant dense<0.000000e+00> : vector<8x128xf32>
    %20 = tpu.matmul %18, %19, %cst_12 {dimension_numbers = #tpu.dot_dimension_numbers<[1], [0], [0], [1], [0, 0, 1, 1], [], []>} : vector<8x128xbf16>, vector<128x128xbf16>, vector<8x128xf32> -> vector<8x128xf32>
    %21 = vector.extract_strided_slice %2 {offsets = [2, 0], sizes = [1, 128], strides = [1, 1]} : vector<3x128xf32> to vector<1x128xf32>
    %22 = vector.broadcast %21 : vector<1x128xf32> to vector<8x128xf32>
    %23 = arith.addf %20, %22 : vector<8x128xf32>
    %c0_13 = arith.constant 0 : index
    %c0_14 = arith.constant 0 : index
    %24 = vector.load %arg6[%c0_13, %c0_14] : memref<8x128xf32, #tpu.memory_space<vmem>>, vector<8x128xf32>
    tpu.vector_store %arg6[%c0_13, %c0_14], %23 {strides = array<i32>} : memref<8x128xf32, #tpu.memory_space<vmem>>, vector<8x128xf32>,
    return
  }
  func.func @transform_0(%arg0: i32) -> (i32, i32) {
    %c0_i32 = arith.constant 0 : i32
    %c0_i32_0 = arith.constant 0 : i32
    return %arg0, %c0_i32 : i32, i32
  }
  func.func @transform_1(%arg0: i32) -> (i32, i32) {
    %c0_i32 = arith.constant 0 : i32
    %c0_i32_0 = arith.constant 0 : i32
    %c0_i32_1 = arith.constant 0 : i32
    return %c0_i32, %c0_i32_0 : i32, i32
  }
  func.func @transform_2(%arg0: i32) -> (i32, i32) {
    %c0_i32 = arith.constant 0 : i32
    %c0_i32_0 = arith.constant 0 : i32
    %c0_i32_1 = arith.constant 0 : i32
    return %c0_i32, %c0_i32_0 : i32, i32
  }
  func.func @transform_3(%arg0: i32) -> (i32, i32) {
    %c0_i32 = arith.constant 0 : i32
    %c0_i32_0 = arith.constant 0 : i32
    %c0_i32_1 = arith.constant 0 : i32
    return %c0_i32, %c0_i32_0 : i32, i32
  }
  func.func @transform_4(%arg0: i32) -> (i32, i32) {
    %c0_i32 = arith.constant 0 : i32
    %c0_i32_0 = arith.constant 0 : i32
    %c0_i32_1 = arith.constant 0 : i32
    return %c0_i32, %c0_i32_0 : i32, i32
  }
  func.func @transform_5(%arg0: i32) -> (i32, i32) {
    %c0_i32 = arith.constant 0 : i32
    %c0_i32_0 = arith.constant 0 : i32
    return %arg0, %c0_i32 : i32, i32
  }
}

</mosaic_0001>

<bundles_post_ra>
// kernel: tpu_custom_call.1
= control target key start
LH: loop header
LB: loop body
LE: loop exit
PB: predicated region body
PF: predicated region fallthrough
CT: control target
= control target key end

     0   :  { %10 = vsyncpa [#allocation3], 0  ;;  %s676_s0 = inlined_call_operand.hbm [shape: f32[8,16], index: 0, kind: input, shape index: {}]   ;;  %s677_s1 = inlined_call_operand.hbm [shape: bf16[16,128], index: 1, kind: input, shape index: {}]   ;;  %s678_s2 = inlined_call_operand.hbm [shape: bf16[128,128], index: 2, kind: input, shape index: {}]   ;;  %s679_s3 = inlined_call_operand.hbm [shape: bf16[128,128], index: 3, kind: input, shape index: {}]   ;;  %s680_s4 = inlined_call_operand.vmem [shape: f32[3,128], index: 4, kind: input, shape index: {}]   ;;  %s681_s5 = inlined_call_operand.hbm [shape: f32[8,128], index: 5, kind: output, shape index: {}]  }
   0x1   :  { %11 = vsyncpa [#allocation6], 0 }
   0x2   :  { %12 = vsyncpa [#allocation9], 0 }
   0x3   :  { %13 = vsyncpa [#allocation4], 0  ;;  %s590_s18 = smov [#allocation5]  }
   0x4   :  { %s29_s19 = sshll.u32 %s590_s18, 4  ;;  %s30_s19 = int_to_ptr.vmem [resolvable:$true] %s29_s19 }
   0x5   :  { %s490_s20 = scalar_lea.vmem %s30_s19, 128  ;;  %p495_p1 = scmp.lt.s32.totalorder %s30_s19, %s30_s19 }
   0x6   :  { %p491_p0 = scmp.ne.s32.totalorder %s30_s19, %s490_s20  ;;  %p496_p2 = scmp.lt.s32.totalorder %s490_s20, %s490_s20 }
   0x8   :  { %p497_p3 = por %p496_p2, %p495_p1 }
   0xa   :  { %p498_p4 = pnand %p497_p3, %p491_p0 }
   0xc   :  { %501 = shalt.err (!%p498_p4)
}
   0xd   :  { %s591_s21 = smov 64   ;;  %s592_s22 = smov 4  }
   0xe   :  { %35 = dma.hbm_to_vmem [thread:$0]  %s677_s1, 128, %s30_s19, [#allocation6], %s591_s21, %s591_s21, %s592_s22  }
   0xf   :  { %s593_s25 = smov [#allocation2]   ;;  %s594_s27 = smov [#allocation7]  }
  0x10   :  { %s20_s26 = sshll.u32 %s593_s25, 4  ;;  %s41_s28 = sshll.u32 %s594_s27, 4  ;;  %s21_s26 = int_to_ptr.vmem [resolvable:$true] %s20_s26  ;;  %s42_s28 = int_to_ptr.vmem [resolvable:$true] %s41_s28 }
  0x11   :  { %s510_s29 = scalar_lea.vmem %s21_s26, 128  ;;  %p515_p6 = scmp.lt.s32.totalorder %s21_s26, %s21_s26 }
  0x12   :  { %p511_p5 = scmp.ne.s32.totalorder %s21_s26, %s510_s29  ;;  %p516_p7 = scmp.lt.s32.totalorder %s510_s29, %s510_s29 }
  0x14   :  { %p517_p8 = por %p516_p7, %p515_p6 }
  0x16   :  { %p518_p9 = pnand %p517_p8, %p511_p5 }
  0x18   :  { %521 = shalt.err (!%p518_p9)
}
  0x19   :  { %23 = dma.hbm_to_vmem [thread:$0]  %s676_s0, 128, %s21_s26, [#allocation3]  }
  0x1a   :  { %s530_s7 = scalar_lea.vmem %s42_s28, 1024  ;;  %p535_p11 = scmp.lt.s32.totalorder %s42_s28, %s42_s28 }
  0x1b   :  { %p531_p10 = scmp.ne.s32.totalorder %s42_s28, %s530_s7  ;;  %p536_p12 = scmp.lt.s32.totalorder %s530_s7, %s530_s7 }
  0x1d   :  { %p537_p13 = por %p536_p12, %p535_p11 }
  0x1f   :  { %p538_p0 = pnand %p537_p13, %p531_p10 }
  0x21   :  { %541 = shalt.err (!%p538_p0)
}
  0x22   :  { %47 = dma.hbm_to_vmem [thread:$0]  %s678_s2, 1024, %s42_s28, [#allocation6], %s591_s21, %s591_s21, %s592_s22  }
  0x23   :  { %s595_s9 = smov [#allocation8]  }
  0x24   :  { %s53_s10 = sshll.u32 %s595_s9, 4  ;;  %s54_s10 = int_to_ptr.vmem [resolvable:$true] %s53_s10 }
  0x25   :  { %s550_s11 = scalar_lea.vmem %s54_s10, 1024  ;;  %p555_p2 = scmp.lt.s32.totalorder %s54_s10, %s54_s10 }
  0x26   :  { %p551_p1 = scmp.ne.s32.totalorder %s54_s10, %s550_s11  ;;  %p556_p3 = scmp.lt.s32.totalorder %s550_s11, %s550_s11 }
  0x28   :  { %p557_p4 = por %p556_p3, %p555_p2 }
  0x2a   :  { %p558_p5 = pnand %p557_p4, %p551_p1 }
  0x2c   :  { %561 = shalt.err (!%p558_p5)
}
  0x2d   :  { %59 = dma.hbm_to_vmem [thread:$0]  %s679_s3, 1024, %s54_s10, [#allocation9], %s591_s21, %s591_s21, %s592_s22  }
  0x2e   :  { %582 = dma.done.wait [#allocation3], 128  }
  0x2f   :  { %583 = vsyncadd [#allocation3], 4294967168 }
  0x30   :  { %584 = dma.done.wait [#allocation6], 1152  }
  0x31   :  { %585 = vsyncadd [#allocation6], 4294966144 }
  0x32   :  { %586 = dma.done.wait [#allocation9], 1024  }
  0x33   :  { %587 = vsyncadd [#allocation9], 4294966272  ;;  %v596_v0 = vmov 0.0   ;;  %vm597_vm0 = vmmov 0   ;;  %v465_v1 = vld [vmem:[#allocation5] sm:$0xff]   ;;  %v75_v2 = vld [vmem:[#allocation2] sm:$0xff]  ;;  %v80_v18 = vlaneseq }
  0x34   :  { %410 = vmatprep.subr.bf16.mxu0 %v596_v0  ;;  %412 = vmatprep.mubr.msk.bf16.mxu0 %vm597_vm0, %v596_v0  ;;  %v76_v3 = vpack.c.bf16 %v75_v2, %v75_v2  ;;  %vm90_vm1 = vcmask 130048   ;;  %v466_v4 = vld [vmem:[#allocation7 + $0x38] sm:$0xff]   ;;  %v467_v5 = vld [vmem:[#allocation7 + $0x30] sm:$0xff]   ;;  %v468_v6 = vld [vmem:[#allocation7 + $0x28] sm:$0xff]  }
  0x35   :  { %416 = vmatprep.subr.bf16.mxu1 %v596_v0  ;;  %432 = vmatprep.mubr.msk.bf16.mxu1 %vm597_vm0, %v596_v0  ;;  %v469_v7 = vld [vmem:[#allocation7 + $0x20] sm:$0xff]   ;;  %v470_v8 = vld [vmem:[#allocation7 + $0x18] sm:$0xff]   ;;  %v471_v9 = vld [vmem:[#allocation7 + $0x10] sm:$0xff]   ;;  %v81_v19 = vshrl.u32 %v80_v18, 7 }
  0x36   :  { %411 = vmatpush3.bf16.msra.mxu0 %v465_v1  ;;  %417 = vmatpush3.bf16.msra.mxu1 %v466_v4  ;;  %v472_v10 = vld [vmem:[#allocation7 + $0x8] sm:$0xff]   ;;  %v473_v11 = vld [vmem:[#allocation7] sm:$0xff]   ;;  %v474_v12 = vld [vmem:[#allocation8 + $0x38] sm:$0xff]  }
  0x37   :  { %436 = vmatprep.subr.bf16.mxu0 %v596_v0  ;;  %418 = vmatprep.subr.bf16.mxu1 %v596_v0  ;;  %v475_v13 = vld [vmem:[#allocation8 + $0x30] sm:$0xff]   ;;  %v476_v14 = vld [vmem:[#allocation8 + $0x28] sm:$0xff]   ;;  %v477_v15 = vld [vmem:[#allocation8 + $0x20] sm:$0xff]   ;;  %v82_v20 = vsub.s32 0, %v81_v19  ;;  %v154_v32 = vsub.s32 1, %v81_v19  ;;  %v264_v41 = vsub.s32 2, %v81_v19 }
  0x38   :  { %v478_v16 = vld [vmem:[#allocation8 + $0x18] sm:$0xff]   ;;  %v479_v17 = vld [vmem:[#allocation8 + $0x10] sm:$0xff]   ;;  %v480_v30 = vld [vmem:[#allocation8 + $0x8] sm:$0xff]  }
  0x39   :  { %413 = vmatmul.mubr.msk.bf16.vlgmr.msra.gmra.mxu0 %vm90_vm1, %v76_v3  ;;  %v77_v21 = vld [vmem:[%s680_s4] sm:$0x7]  ;;  %v481_v31 = vld [vmem:[#allocation8] sm:$0xff]   ;;  %s598_s4 = smov [#allocation10]  }
  0x3a   :  { %452 = vmatprep.mubr.msk.bf16.mxu0 %vm597_vm0, %v596_v0  ;;  %419 = vmatpush3.bf16.msra.mxu1 %v467_v5  ;;  %v83_v22 = vrot.slane %v77_v21, %v82_v20  ;;  %v155_v33 = vrot.slane %v77_v21, %v154_v32  ;;  %v265_v42 = vrot.slane %v77_v21, %v264_v41  ;;  %s361_s13 = sshll.u32 %s598_s4, 4  ;;  %s362_s13 = int_to_ptr.vmem [resolvable:$true] %s361_s13 }
  0x3b   :  { %420 = vmatprep.subr.bf16.mxu1 %v596_v0  ;;  %437 = vmatpush3.bf16.msra.mxu0 %v474_v12  ;;  %s562_s14 = scalar_lea.vmem %s362_s13, 128  ;;  %p567_p7 = scmp.lt.s32.totalorder %s362_s13, %s362_s13 }
  0x3c   :  { %438 = vmatprep.subr.bf16.mxu0 %v596_v0  ;;  %p563_p6 = scmp.ne.s32.totalorder %s362_s13, %s562_s14  ;;  %p568_p8 = scmp.lt.s32.totalorder %s562_s14, %s562_s14 }
  0x3e   :  { %421 = vmatpush3.bf16.msra.mxu1 %v468_v6  ;;  %p569_p9 = por %p568_p8, %p567_p7 }
  0x3f   :  { %422 = vmatprep.subr.bf16.mxu1 %v596_v0  ;;  %439 = vmatpush3.bf16.msra.mxu0 %v475_v13 }
  0x40   :  { %440 = vmatprep.subr.bf16.mxu0 %v596_v0  ;;  %p570_p10 = pnand %p569_p9, %p563_p6 }
  0x42   :  { %423 = vmatpush3.bf16.msra.mxu1 %v469_v7 }
  0x43   :  { %424 = vmatprep.subr.bf16.mxu1 %v596_v0  ;;  %441 = vmatpush3.bf16.msra.mxu0 %v476_v14 }
  0x44   :  { %442 = vmatprep.subr.bf16.mxu0 %v596_v0 }
  0x46   :  { %425 = vmatpush3.bf16.msra.mxu1 %v470_v8 }
  0x47   :  { %426 = vmatprep.subr.bf16.mxu1 %v596_v0  ;;  %443 = vmatpush3.bf16.msra.mxu0 %v477_v15 }
  0x48   :  { %444 = vmatprep.subr.bf16.mxu0 %v596_v0 }
  0x4a   :  { %427 = vmatpush3.bf16.msra.mxu1 %v471_v9 }
  0x4b   :  { %428 = vmatprep.subr.bf16.mxu1 %v596_v0  ;;  %445 = vmatpush3.bf16.msra.mxu0 %v478_v16 }
  0x4c   :  { %446 = vmatprep.subr.bf16.mxu0 %v596_v0 }
  0x4e   :  { %429 = vmatpush3.bf16.msra.mxu1 %v472_v10 }
  0x4f   :  { %430 = vmatprep.subr.bf16.mxu1 %v596_v0  ;;  %447 = vmatpush3.bf16.msra.mxu0 %v479_v17 }
  0x50   :  { %448 = vmatprep.subr.bf16.mxu0 %v596_v0 }
  0x52   :  { %431 = vmatpush3.bf16.msra.mxu1 %v473_v11 }
  0x53   :  { %449 = vmatpush3.bf16.msra.mxu0 %v480_v30 }
  0x54   :  { %450 = vmatprep.subr.bf16.mxu0 %v596_v0 }
  0x57   :  { %451 = vmatpush3.bf16.msra.mxu0 %v481_v31 }
  0xf9   :  { %v128_v23 = vpop.f32.mrf.mxu0 }
  0xfa   :  { %v129_v24 = vadd.f32 %v128_v23, %v83_v22 }
  0xfb   :  { %v414_v25 = vpop.f32.mrf.mxu0 }
  0xfc   :  { %v134_v26 = vmax.f32 %v129_v24, 0.0 }
  0xfd   :  { %v131_v27 = vpop.f32.mrf.mxu0 }
  0xfe   :  { %v135_v28 = vpack.c.bf16 %v134_v26, %v134_v26 }
  0xff   :  { %v415_v29 = vpop.f32.mrf.mxu0 }
 0x100   :  { %433 = vmatmul.mubr.bf16.vlgmr.msra.gmra.mxu1 %v135_v28 }
 0x1c0   :  { %v238_v34 = vpop.f32.mrf.mxu1 }
 0x1c1   :  { %v239_v35 = vadd.f32 %v238_v34, %v155_v33 }
 0x1c2   :  { %v434_v36 = vpop.f32.mrf.mxu1 }
 0x1c3   :  { %v244_v37 = vmax.f32 %v239_v35, 0.0 }
 0x1c4   :  { %v241_v38 = vpop.f32.mrf.mxu1 }
 0x1c5   :  { %v245_v39 = vpack.c.bf16 %v244_v37, %v244_v37 }
 0x1c6   :  { %v435_v40 = vpop.f32.mrf.mxu1 }
 0x1c7   :  { %453 = vmatmul.mubr.bf16.vlgmr.msra.gmra.mxu0 %v245_v39 }
 0x287   :  { %v348_v43 = vpop.f32.mrf.mxu0 }
 0x288   :  { %v349_v44 = vadd.f32 %v348_v43, %v265_v42 }
 0x289   :  { %v454_v45 = vpop.f32.mrf.mxu0 }
 0x28a   :  { %354 = vst [vmem:[#allocation10] sm:$0xff] %v349_v44 }
 0x28b   :  { %v351_v46 = vpop.f32.mrf.mxu0 }
 0x28c   :  { %573 = shalt.err (!%p570_p10)
}
 0x28d   :  { %364 = dma.vmem_to_hbm [thread:$0]  %s362_s13, 128, %s681_s5, [#allocation4]   ;;  %v455_v47 = vpop.f32.mrf.mxu0 }
 0x28e   :  { %588 = dma.done.wait [#allocation4], 128  }
 0x28f   :  { %589 = vsyncadd [#allocation4], 4294967168 }
 0x290   :  { %368 = vsyncpa [#allocation3], 1 }
 0x291   :  { %369 = vsyncpa [#allocation6], 1 }
 0x292   :  { %370 = vsyncpa [#allocation9], 1 }
 0x293   :  { %371 = vsyncpa [#allocation4], 1 }

</bundles_post_ra>
